<compile_context>
chip_gen: v5e
topology: v5e:2x2
jax: 0.10.0
libtpu: 0.0.40
codegen_flags: <defaults>
</compile_context>

<pallas_src>
import functools

import jax
import jax.numpy as jnp
from jax.experimental import pallas as pl
from jax.experimental.pallas import tpu as pltpu


def _round_up(x, m):
    return (x + m - 1) // m * m


def _vmem_capacity_bytes():
    try:
        return int(pltpu.get_tpu_info().vmem_capacity_bytes)
    except Exception:
        return 64 << 20  # conservative: v7x per-TensorCore VMEM


def _choose_tm(N, C, x_dtype, t_dtype, *, max_tm=1024, vmem_budget_bytes=None):
    """Largest sublane-aligned row tile whose double-buffered inputs fit the budget."""
    xi = jnp.dtype(x_dtype).itemsize
    ti = jnp.dtype(t_dtype).itemsize
    sub = 16 if min(xi, ti) < 4 else 8  # bf16 tiles are (16, 128); f32 are (8, 128)
    if vmem_budget_bytes is None:
        vmem_budget_bytes = int(0.4 * _vmem_capacity_bytes())
    per_row = 2 * C * (xi + ti)  # 2 pipeline buffers per input
    cap = max(sub, vmem_budget_bytes // max(per_row, 1))
    tm = int(min(cap, max_tm, _round_up(N, sub)))
    tm = max(sub, (tm // sub) * sub)
    return tm


def _label_smoothing_kernel(x_ref, t_ref, out_ref, *, scale, alpha, smoothing,
                            inv_c, fused, n_rows, block_rows, mask_tail):
    """Reduce one (tm, C) row tile to a single f32 partial-loss sum in SMEM."""
    i = pl.program_id(0)

    x = x_ref[...].astype(jnp.float32)  # (tm, C)

    # Numerically stable logsumexp over the class (lane) dimension.
    m = jnp.max(x, axis=-1, keepdims=True)                               # (tm, 1)
    z = m + jnp.log(jnp.sum(jnp.exp(x - m), axis=-1, keepdims=True))     # (tm, 1)

    if fused:
        # t' = t + smoothing / (confidence * C);
        # confidence*nll + smoothing*smooth == confidence*(z*sum(t') - sum(t'*x)).
        t = t_ref[...].astype(jnp.float32) + alpha                       # (tm, C)
        sum_t = jnp.sum(t, axis=-1, keepdims=True)                       # (tm, 1)
        sum_tx = jnp.sum(t * x, axis=-1, keepdims=True)                  # (tm, 1)
        row_loss = scale * (z * sum_t - sum_tx)                          # (tm, 1)
    else:
        # confidence == 0 (smoothing == 1): loss = smoothing * (z - mean(x)).
        row_loss = smoothing * (z - jnp.sum(x, axis=-1, keepdims=True) * inv_c)

    if mask_tail:
        rid = i * block_rows + jax.lax.broadcasted_iota(jnp.int32, row_loss.shape, 0)
        row_loss = jnp.where(rid < n_rows, row_loss, 0.0)

    out_ref[i] = jnp.sum(row_loss)


def label_smoothing_loss(x, target, smoothing=0.05, *, tm=None):
    """Training-mode LabelSmoothing forward. x, target: [N, C]. Returns scalar f32.

    Pass bf16 (or f32) x/target directly; the kernel upcasts per tile to f32.
    """
    N, C = x.shape
    assert target.shape == (N, C)
    smoothing = float(smoothing)
    confidence = 1.0 - smoothing

    sub = 16 if min(x.dtype.itemsize, target.dtype.itemsize) < 4 else 8
    if tm is None:
        tm = _choose_tm(N, C, x.dtype, target.dtype)
    else:
        tm = max(sub, _round_up(int(tm), sub))

    num_tiles = pl.cdiv(N, tm)
    mask_tail = (N % tm) != 0

    fused = confidence > 0.0
    alpha = (smoothing / (confidence * C)) if fused else 0.0

    kernel = functools.partial(
        _label_smoothing_kernel,
        scale=confidence,
        alpha=alpha,
        smoothing=smoothing,
        inv_c=1.0 / C,
        fused=fused,
        n_rows=N,
        block_rows=tm,
        mask_tail=mask_tail,
    )

    vmem_cap = _vmem_capacity_bytes()
    vmem_limit = int(min(0.75 * vmem_cap, 100 * 1024 * 1024))

    partials = pl.pallas_call(
        kernel,
        out_shape=jax.ShapeDtypeStruct((num_tiles,), jnp.float32),
        grid=(num_tiles,),
        in_specs=[
            pl.BlockSpec((tm, C), lambda i: (i, 0)),
            pl.BlockSpec((tm, C), lambda i: (i, 0)),
        ],
        # One f32 partial per grid step, kept resident in SMEM (no lane-sparse
        # VMEM writeback).  The output is grid-resident, so the axis is marked
        # "arbitrary"; on single-TC chips (v5e/v6e) this costs nothing.
        out_specs=pl.BlockSpec(memory_space=pltpu.SMEM),
        compiler_params=pltpu.CompilerParams(
            dimension_semantics=("arbitrary",),
            vmem_limit_bytes=vmem_limit,
        ),
    )(x, target)

    return jnp.sum(partials) / jnp.float32(N)


def _reference(x, target, smoothing=0.05):
    x = x.astype(jnp.float32)
    target = target.astype(jnp.float32)
    logprobs = jax.nn.log_softmax(x, axis=-1)
    nll = jnp.sum(-logprobs * target, axis=-1)
    smooth = jnp.mean(-logprobs, axis=-1)
    return jnp.mean((1.0 - smoothing) * nll + smoothing * smooth)


if __name__ == "__main__":
    key = jax.random.PRNGKey(0)
    kx, kl, kx2, kl2 = jax.random.split(key, 4)

    # Case 1: small lane-aligned f32 batch, auto-sized tile (single grid step).
    N, C = 32, 128
    x = jax.random.normal(kx, (N, C), dtype=jnp.float32)
    labels = jax.random.randint(kl, (N,), 0, C)
    target = jax.nn.one_hot(labels, C, dtype=jnp.float32)
    ref = _reference(x, target, smoothing=0.05)
    loss = jax.block_until_ready(label_smoothing_loss(x, target, smoothing=0.05))
    assert jnp.allclose(loss, ref, atol=1e-5, rtol=1e-5), (loss, ref)

    # Case 2: forced multi-tile grid (pipelined path).
    loss_tiled = jax.block_until_ready(
        label_smoothing_loss(x, target, smoothing=0.05, tm=8)
    )
    assert jnp.allclose(loss_tiled, ref, atol=1e-5, rtol=1e-5), (loss_tiled, ref)

    # Case 3: ragged batch (N not a sublane multiple) with bf16 inputs.
    N2, C2 = 50, 256
    x2 = jax.random.normal(kx2, (N2, C2), dtype=jnp.bfloat16)
    labels2 = jax.random.randint(kl2, (N2,), 0, C2)
    target2 = jax.nn.one_hot(labels2, C2, dtype=jnp.bfloat16)
    ref2 = _reference(x2, target2, smoothing=0.05)
    loss2 = jax.block_until_ready(
        label_smoothing_loss(x2, target2, smoothing=0.05, tm=16)
    )
    assert jnp.allclose(loss2, ref2, atol=1e-4, rtol=1e-4), (loss2, ref2)

    print("KERNEL_OK")
</pallas_src>

<mosaic_0001>
module attributes {stable_mosaic.version = 11 : i64} {
  func.func @_label_smoothing_kernel(%arg0: i32, %arg1: memref<32x128xf32, #tpu.memory_space<vmem>>, %arg2: memref<32x128xf32, #tpu.memory_space<vmem>>, %arg3: memref<1xf32, #tpu.memory_space<smem>>) attributes {dimension_semantics = [#tpu.dimension_semantics<arbitrary>], iteration_bounds = array<i64: 1>, scalar_prefetch = 0 : i64, scratch_operands = 0 : i64, tpu.core_type = #tpu.core_type<tc>, window_params = [{transform_indices = @transform_0, window_bounds = array<i64: 32, 128>}, {transform_indices = @transform_1, window_bounds = array<i64: 32, 128>}, {transform_indices = @transform_2, window_bounds = array<i64: 1>}]} {
    %c0 = arith.constant 0 : index
    %c0_0 = arith.constant 0 : index
    %0 = vector.load %arg1[%c0, %c0_0] : memref<32x128xf32, #tpu.memory_space<vmem>>, vector<32x128xf32>
    %cst = arith.constant dense<0xFF800000> : vector<32xf32>
    %1 = vector.multi_reduction <maximumf>, %0, %cst [1] : vector<32x128xf32> to vector<32xf32>
    %2 = vector.shape_cast %1 : vector<32xf32> to vector<32x1xf32>
    %3 = vector.broadcast %2 : vector<32x1xf32> to vector<32x128xf32>
    %4 = arith.subf %0, %3 : vector<32x128xf32>
    %5 = math.exp %4 : vector<32x128xf32>
    %cst_1 = arith.constant dense<0.000000e+00> : vector<32xf32>
    %6 = vector.multi_reduction <add>, %5, %cst_1 [1] : vector<32x128xf32> to vector<32xf32>
    %7 = vector.shape_cast %6 : vector<32xf32> to vector<32x1xf32>
    %8 = math.log %7 : vector<32x1xf32>
    %9 = arith.addf %2, %8 : vector<32x1xf32>
    %c0_2 = arith.constant 0 : index
    %c0_3 = arith.constant 0 : index
    %10 = vector.load %arg2[%c0_2, %c0_3] : memref<32x128xf32, #tpu.memory_space<vmem>>, vector<32x128xf32>
    %cst_4 = arith.constant 4.11184214E-4 : f32
    %11 = vector.broadcast %cst_4 : f32 to vector<32x128xf32>
    %12 = arith.addf %10, %11 : vector<32x128xf32>
    %cst_5 = arith.constant dense<0.000000e+00> : vector<32xf32>
    %13 = vector.multi_reduction <add>, %12, %cst_5 [1] : vector<32x128xf32> to vector<32xf32>
    %14 = vector.shape_cast %13 : vector<32xf32> to vector<32x1xf32>
    %15 = arith.mulf %12, %0 : vector<32x128xf32>
    %cst_6 = arith.constant dense<0.000000e+00> : vector<32xf32>
    %16 = vector.multi_reduction <add>, %15, %cst_6 [1] : vector<32x128xf32> to vector<32xf32>
    %17 = vector.shape_cast %16 : vector<32xf32> to vector<32x1xf32>
    %18 = arith.mulf %9, %14 : vector<32x1xf32>
    %19 = arith.subf %18, %17 : vector<32x1xf32>
    %cst_7 = arith.constant 0.949999988 : f32
    %20 = vector.broadcast %cst_7 : f32 to vector<32x1xf32>
    %21 = arith.mulf %20, %19 : vector<32x1xf32>
    %22 = vector.shape_cast %21 : vector<32x1xf32> to vector<1x32x1xf32>
    %cst_8 = arith.constant dense<0.000000e+00> : vector<1xf32>
    %23 = vector.multi_reduction <add>, %22, %cst_8 [1, 2] : vector<1x32x1xf32> to vector<1xf32>
    %24 = vector.shape_cast %23 : vector<1xf32> to vector<1x1x1xf32>
    %25 = vector.extract %24[0, 0, 0] : f32 from vector<1x1x1xf32>
    %26 = arith.index_cast %arg0 : i32 to index
    %27 = memref.load %arg3[%26] : memref<1xf32, #tpu.memory_space<smem>>
    memref.store %25, %arg3[%26] : memref<1xf32, #tpu.memory_space<smem>>
    return
  }
  func.func @transform_0(%arg0: i32) -> (i32, i32) {
    %c0_i32 = arith.constant 0 : i32
    %c0_i32_0 = arith.constant 0 : i32
    return %arg0, %c0_i32 : i32, i32
  }
  func.func @transform_1(%arg0: i32) -> (i32, i32) {
    %c0_i32 = arith.constant 0 : i32
    %c0_i32_0 = arith.constant 0 : i32
    return %arg0, %c0_i32 : i32, i32
  }
  func.func @transform_2(%arg0: i32) -> i32 {
    %c0_i32 = arith.constant 0 : i32
    %c0_i32_0 = arith.constant 0 : i32
    return %c0_i32 : i32
  }
}

</mosaic_0001>

<bundles_post_ra>
// kernel: tpu_custom_call.1
= control target key start
LH: loop header
LB: loop body
LE: loop exit
PB: predicated region body
PF: predicated region fallthrough
CT: control target
= control target key end

     0   :  { %7 = vsyncpa [#allocation3], 0  ;;  %s286_s0 = inlined_call_operand.hbm [shape: f32[32,128], index: 0, kind: input, shape index: {}]   ;;  %s287_s1 = inlined_call_operand.hbm [shape: f32[32,128], index: 1, kind: input, shape index: {}]   ;;  %s288_s2 = inlined_call_operand.hbm [shape: f32[1], index: 2, kind: output, shape index: {}]  }
   0x1   :  { %8 = vsyncpa [#allocation6], 0 }
   0x2   :  { %9 = vsyncpa [#allocation4], 0  ;;  %s14_s11 = sshll.u32 %s286_s0, 4  ;;  %s253_s12 = smov [#allocation2]   ;;  %s15_s11 = int_to_ptr.hbm [resolvable:$true] %s14_s11 }
   0x3   :  { %s16_s13 = sshll.u32 %s253_s12, 4  ;;  %s27_s16 = sshll.u32 %s287_s1, 4  ;;  %s17_s13 = int_to_ptr.vmem [resolvable:$true] %s16_s13  ;;  %s28_s16 = int_to_ptr.hbm [resolvable:$true] %s27_s16 }
   0x4   :  { %s254_s17 = smov 128   ;;  %s255_s18 = smov 8  }
   0x5   :  { %22 = dma.hbm_to_vmem [thread:$0]  %s15_s11, 512, %s17_s13, [#allocation3], %s254_s17, %s254_s17, %s255_s18  }
   0x6   :  { %s256_s19 = smov [#allocation5]  }
   0x7   :  { %s29_s20 = sshll.u32 %s256_s19, 4  ;;  %s30_s20 = int_to_ptr.vmem [resolvable:$true] %s29_s20 }
   0x8   :  { %35 = dma.hbm_to_vmem [thread:$0]  %s28_s16, 512, %s30_s20, [#allocation6], %s254_s17, %s254_s17, %s255_s18  }
   0x9   :  { %247 = dma.done.wait [#allocation3], 512  }
   0xa   :  { %248 = vsyncadd [#allocation3], 4294966784 }
   0xb   :  { %249 = dma.done.wait [#allocation6], 512  }
   0xc   :  { %250 = vsyncadd [#allocation6], 4294966784  ;;  %v46_v0 = vld [vmem:[#allocation2 + $0x10] sm:$0xff]  ;;  %v44_v1 = vld [vmem:[#allocation2] sm:$0xff]  ;;  %vm128_vm0 = vcmask 7168   ;;  %s152_s21 = sshll.u32 %s288_s2, 4  ;;  %s153_s21 = int_to_ptr.hbm [resolvable:$true] %s152_s21 }
   0xd   :  { %52 = vmax.xlane.f32.xlu1 %v46_v0  ;;  %48 = vmax.xlane.f32.xlu0 %v44_v1  ;;  %v47_v2 = vld [vmem:[#allocation2 + $0x18] sm:$0xff]  ;;  %v45_v3 = vld [vmem:[#allocation2 + $0x8] sm:$0xff]  ;;  %v88_v4 = vld [vmem:[#allocation5] sm:$0xff]  ;;  %s257_s23 = smov [#allocation7]  }
   0xe   :  { %v89_v5 = vld [vmem:[#allocation5 + $0x8] sm:$0xff]  ;;  %v92_v6 = vadd.f32 0.0004111842, %v88_v4  ;;  %v91_v23 = vld [vmem:[#allocation5 + $0x18] sm:$0xff]  ;;  %v90_v27 = vld [vmem:[#allocation5 + $0x10] sm:$0xff] }
   0xf   :  { %v93_v7 = vadd.f32 0.0004111842, %v89_v5  ;;  %v95_v26 = vadd.f32 0.0004111842, %v91_v23  ;;  %v94_v28 = vadd.f32 0.0004111842, %v90_v27 }
  0x10   :  { %96 = vadd.xlane.f32.xlu2 %v92_v6  ;;  %v104_v30 = vmul.f32 %v92_v6, %v44_v1 }
  0x11   :  { %v105_v22 = vmul.f32 %v93_v7, %v45_v3  ;;  %v107_v29 = vmul.f32 %v95_v26, %v47_v2  ;;  %v106_v31 = vmul.f32 %v94_v28, %v46_v0 }
  0x15   :  { %54 = vmax.xlane.f32.xlu1 %v47_v2  ;;  %50 = vmax.xlane.f32.xlu0 %v45_v3 }
  0x1d   :  { %98 = vadd.xlane.f32.xlu0 %v93_v7 }
  0x80   :  { %v279_v8 = vpop.xlane.xlu1 %52  ;;  %v49_v9 = vpop.xlane.xlu0 %48 }
  0x81   :  { %v58_v10 = vsub.f32 %v46_v0, %v279_v8  ;;  %v56_v11 = vsub.f32 %v44_v1, %v49_v9 }
  0x83   :  { %v64_v12 = vmul.f32 1.442695, %v58_v10  ;;  %v60_v13 = vmul.f32 1.442695, %v56_v11  ;;  %v97_v32 = vpop.xlane.xlu2 %96 }
  0x85   :  { %171 = vpow2.f32 %v64_v12 }
  0x86   :  { %173 = vpow2.f32 %v60_v13 }
  0x88   :  { %v55_v14 = vpop.xlane.xlu1 %54  ;;  %v51_v15 = vpop.xlane.xlu0 %50 }
  0x89   :  { %v59_v16 = vsub.f32 %v47_v2, %v55_v14  ;;  %v57_v17 = vsub.f32 %v45_v3, %v51_v15 }
  0x8b   :  { %v172_v18 = vpop.eup %171  ;;  %v66_v19 = vmul.f32 1.442695, %v59_v16  ;;  %v62_v20 = vmul.f32 1.442695, %v57_v17 }
  0x8c   :  { %v174_v21 = vpop.eup %173  ;;  %72 = vadd.xlane.f32.xlu0 %v172_v18 }
  0x8d   :  { %175 = vpow2.f32 %v66_v19  ;;  %68 = vadd.xlane.f32.xlu2 %v174_v21 }
  0x8e   :  { %177 = vpow2.f32 %v62_v20 }
  0x90   :  { %v99_v33 = vpop.xlane.xlu0 %98 }
  0x93   :  { %v176_v24 = vpop.eup %175 }
  0x94   :  { %v178_v25 = vpop.eup %177  ;;  %74 = vadd.xlane.f32.xlu1 %v176_v24  ;;  %110 = vadd.xlane.f32.xlu0 %v105_v22 }
  0x95   :  { %70 = vadd.xlane.f32.xlu2 %v178_v25 }
  0x9c   :  { %100 = vadd.xlane.f32.xlu1 %v94_v28  ;;  %114 = vadd.xlane.f32.xlu0 %v107_v29 }
  0x9d   :  { %108 = vadd.xlane.f32.xlu2 %v104_v30 }
  0xa4   :  { %102 = vadd.xlane.f32.xlu1 %v95_v26 }
  0xa5   :  { %112 = vadd.xlane.f32.xlu2 %v106_v31 }
  0xff   :  { %v73_v35 = vpop.xlane.xlu0 %72 }
 0x100   :  { %v69_v34 = vpop.xlane.xlu2 %68 }
 0x101   :  { %179 = vlog2.f32 %v69_v34 }
 0x102   :  { %181 = vlog2.f32 %v73_v35 }
 0x107   :  { %v180_v36 = vpop.eup %179  ;;  %v75_v37 = vpop.xlane.xlu1 %74 }
 0x108   :  { %v77_v38 = vmul.f32 0.6931472, %v180_v36  ;;  %183 = vlog2.f32 %v75_v37  ;;  %v71_v39 = vpop.xlane.xlu2 %70  ;;  %v182_v41 = vpop.eup %181 }
 0x109   :  { %185 = vlog2.f32 %v71_v39  ;;  %v111_v42 = vpop.xlane.xlu0 %110  ;;  %v81_v49 = vmul.f32 0.6931472, %v182_v41 }
 0x10a   :  { %v84_v40 = vadd.f32 %v77_v38, %v49_v9 }
 0x10b   :  { %v86_v54 = vadd.f32 %v81_v49, %v279_v8 }
 0x10c   :  { %v116_v47 = vmul.f32 %v97_v32, %v84_v40 }
 0x10e   :  { %v184_v43 = vpop.eup %183 }
 0x10f   :  { %v186_v44 = vpop.eup %185  ;;  %v101_v45 = vpop.xlane.xlu1 %100  ;;  %v83_v50 = vmul.f32 0.6931472, %v184_v43 }
 0x110   :  { %v79_v46 = vmul.f32 0.6931472, %v186_v44  ;;  %v109_v48 = vpop.xlane.xlu2 %108  ;;  %v118_v58 = vmul.f32 %v101_v45, %v86_v54 }
 0x111   :  { %v120_v52 = vsub.f32 %v116_v47, %v109_v48  ;;  %v87_v57 = vadd.f32 %v83_v50, %v55_v14  ;;  %v115_v60 = vpop.xlane.xlu0 %114 }
 0x112   :  { %v85_v51 = vadd.f32 %v79_v46, %v51_v15 }
 0x113   :  { %v124_v55 = vmul.f32 0.95, %v120_v52 }
 0x114   :  { %v117_v53 = vmul.f32 %v99_v33, %v85_v51 }
 0x115   :  { %v129_v1 = vsel %vm128_vm0, %v124_v55, 0.0 }
 0x116   :  { %v121_v56 = vsub.f32 %v117_v53, %v111_v42 }
 0x117   :  { %v103_v59 = vpop.xlane.xlu1 %102 }
 0x118   :  { %v125_v61 = vmul.f32 0.95, %v121_v56  ;;  %v119_v62 = vmul.f32 %v103_v59, %v87_v57  ;;  %v113_v63 = vpop.xlane.xlu2 %112 }
 0x119   :  { %v122_v0 = vsub.f32 %v118_v58, %v113_v63 }
 0x11a   :  { %v130_v2 = vsel %vm128_vm0, %v125_v61, 0.0  ;;  %v123_v3 = vsub.f32 %v119_v62, %v115_v60 }
 0x11b   :  { %v131_v4 = vadd.f32 %v130_v2, %v129_v1  ;;  %v126_v5 = vmul.f32 0.95, %v122_v0 }
 0x11c   :  { %v127_v6 = vmul.f32 0.95, %v123_v3 }
 0x11d   :  { %v132_v7 = vsel %vm128_vm0, %v126_v5, 0.0 }
 0x11e   :  { %v133_v9 = vadd.f32 %v132_v7, %v131_v4  ;;  %v134_v8 = vsel %vm128_vm0, %v127_v6, 0.0 }
 0x120   :  { %v135_v10 = vadd.f32 %v134_v8, %v133_v9 }
 0x122   :  { %136 = vadd.xlane.f32.xlu1 %v135_v10 }
 0x195   :  { %v137_v11 = vpop.xlane.xlu1 %136 }
 0x196   :  { %v138_v12 = vrot.slane %v137_v11, 4 }
 0x198   :  { %v139_v13 = vadd.f32 %v138_v12, %v137_v11 }
 0x19a   :  { %v140_v14 = vrot.slane %v139_v13, 2 }
 0x19c   :  { %v141_v15 = vadd.f32 %v140_v14, %v139_v13 }
 0x19e   :  { %v142_v16 = vrot.slane %v141_v15, 1 }
 0x1a0   :  { %v143_v17 = vadd.f32 %v142_v16, %v141_v15 }
 0x1a2   :  { %164 = vpush %v143_v17 }
 0x1d3   :  { %s165_s22 = spop %164 }
 0x1d4   :  { %146 = sst [smem:[#allocation7]] %s165_s22 }
 0x1d5   :  { %155 = dma.smem_to_hbm %s257_s23, 16, %s153_s21, [#allocation4]  }
 0x1d6   :  { %251 = dma.done.wait [#allocation4], 16  }
 0x1d7   :  { %252 = vsyncadd [#allocation4], 4294967280 }
 0x1d8   :  { %160 = sfence }
 0x1d9   :  { %161 = vsyncpa [#allocation3], 1 }
 0x1da   :  { %162 = vsyncpa [#allocation6], 1 }
 0x1db   :  { %163 = vsyncpa [#allocation4], 1 }

</bundles_post_ra>
